<compile_context>
chip_gen: v7x
topology: tpu7x:2x2x1
jax: 0.10.0
libtpu: 0.0.40
codegen_flags: <defaults>
</compile_context>

<pallas_src>
import functools

import jax
import jax.numpy as jnp
from jax.experimental import pallas as pl
from jax.experimental.pallas import tpu as pltpu


def _attn_kernel(ctx_ref, ent_ref, n_ref, w_ref, b_ref, out_ref):
    TB, Q, Dq = ctx_ref.shape
    Dk = w_ref.shape[1]

    # Linear: y = x @ W^T + b.  W is already transposed to (Dq, Dk) in the
    # wrapper, and the matmul is fused across all TB*Q rows of the block.
    ctx2d = ctx_ref[...].reshape(TB * Q, Dq)
    proj = jnp.dot(ctx2d, w_ref[...], preferred_element_type=jnp.float32)
    proj = (proj + b_ref[...]).reshape(TB, Q, Dk)

    # Batched scores: contract the last dim of proj and ent directly
    # (no transposed VMEM copy of ent).
    scores = jnp.einsum("bqd,bsd->bqs", proj, ent_ref[...],
                        preferred_element_type=jnp.float32)   # (TB, Q, S)

    # Mask columns >= entity_num (same as masked_fill_(mask, -inf)).
    # NOTE: entity_num == 0 yields an all-NaN row, exactly like the PyTorch
    # reference (softmax of an all -inf row).
    n = n_ref[...]                                            # (TB, 1, 1) int32
    col = jax.lax.broadcasted_iota(jnp.int32, scores.shape, 2)
    scores = jnp.where(col >= n, -jnp.inf, scores)

    # Row softmax, f32 throughout.
    m = jnp.max(scores, axis=-1, keepdims=True)
    e = jnp.exp(scores - m)
    s = jnp.sum(e, axis=-1, keepdims=True)
    # approx=False keeps exact parity with F.softmax; switch to approx=True
    # if a ~1e-4 relative error is acceptable (moves the divide to the EUP).
    out_ref[...] = (e * pl.reciprocal(s, approx=False)).astype(out_ref.dtype)


@functools.partial(jax.jit, static_argnames=("block_b",))
def single_head_attention(context, ent, entity_num_list, weight, bias,
                          block_b=8):
    """context: (B, Q, Dq)  ent: (B, S, Dk)  entity_num_list: (B,) int
       weight: (Dk, Dq) (PyTorch nn.Linear layout)  bias: (Dk,)
       returns attn: (B, Q, S) float32"""
    B, Q, Dq = context.shape
    _, S, Dk = ent.shape

    TB = min(block_b, B)
    num_blocks = pl.cdiv(B, TB)
    B_pad = num_blocks * TB
    if B_pad != B:                       # pad batch to a multiple of TB
        pad = B_pad - B
        context = jnp.pad(context, ((0, pad), (0, 0), (0, 0)))
        ent = jnp.pad(ent, ((0, pad), (0, 0), (0, 0)))
        entity_num_list = jnp.pad(entity_num_list, (0, pad),
                                  constant_values=S)   # keep padded rows finite

    w_t = weight.T.astype(jnp.float32)                 # (Dq, Dk), folded once by XLA
    bias2d = bias.reshape(1, Dk).astype(jnp.float32)
    n3d = entity_num_list.astype(jnp.int32).reshape(B_pad, 1, 1)

    out = pl.pallas_call(
        _attn_kernel,
        out_shape=jax.ShapeDtypeStruct((B_pad, Q, S), jnp.float32),
        grid=(num_blocks,),
        in_specs=[
            pl.BlockSpec((TB, Q, Dq), lambda i: (i, 0, 0)),   # context block
            pl.BlockSpec((TB, S, Dk), lambda i: (i, 0, 0)),   # ent block
            pl.BlockSpec((TB, 1, 1), lambda i: (i, 0, 0)),    # entity_num block
            pl.BlockSpec((Dq, Dk), lambda i: (0, 0)),         # W^T (grid-invariant)
            pl.BlockSpec((1, Dk), lambda i: (0, 0)),          # bias (grid-invariant)
        ],
        out_specs=pl.BlockSpec((TB, Q, S), lambda i: (i, 0, 0)),
        compiler_params=pltpu.CompilerParams(
            # Batches are fully independent -> shard across v7x's 2 TCs.
            dimension_semantics=("parallel",)),
    )(context, ent, n3d, w_t, bias2d)

    return out[:B]


def _reference(context, ent, entity_num_list, weight, bias):
    proj = jnp.einsum("bqd,kd->bqk", context, weight) + bias[None, None, :]
    scores = jnp.einsum("bqk,bsk->bqs", proj, ent)
    col = jnp.arange(ent.shape[1])[None, None, :]
    mask = col >= entity_num_list[:, None, None]
    scores = jnp.where(mask, -jnp.inf, scores)
    return jax.nn.softmax(scores, axis=-1)


if __name__ == "__main__":
    Q, S = 8, 16
    query_dim, key_dim = 32, 32

    key = jax.random.PRNGKey(0)
    k_ctx, k_ent, k_w, k_b, k_ctx2, k_ent2, k_n2 = jax.random.split(key, 7)

    # deterministic "nn.Linear(query_dim, key_dim)" parameters
    bound = 1.0 / (query_dim ** 0.5)
    weight = jax.random.uniform(k_w, (key_dim, query_dim),
                                minval=-bound, maxval=bound, dtype=jnp.float32)
    bias = jax.random.uniform(k_b, (key_dim,),
                              minval=-bound, maxval=bound, dtype=jnp.float32)

    # --- case 1: toy size from the module spec (B=2) ---
    B = 2
    context = jax.random.normal(k_ctx, (B, Q, query_dim), dtype=jnp.float32)
    ent = jax.random.normal(k_ent, (B, S, key_dim), dtype=jnp.float32)
    entity_num_list = jnp.array([5, 16], dtype=jnp.int32)

    attn = single_head_attention(context, ent, entity_num_list, weight, bias)
    attn = jax.block_until_ready(attn)
    ref = _reference(context, ent, entity_num_list, weight, bias)
    assert attn.shape == (B, Q, S)
    assert jnp.allclose(attn, ref, atol=1e-5, rtol=1e-5)

    # --- case 2: B not a multiple of the batch block (exercises padding/grid) ---
    B2 = 10
    context2 = jax.random.normal(k_ctx2, (B2, Q, query_dim), dtype=jnp.float32)
    ent2 = jax.random.normal(k_ent2, (B2, S, key_dim), dtype=jnp.float32)
    entity_num_list2 = jax.random.randint(k_n2, (B2,), 1, S + 1, dtype=jnp.int32)

    attn2 = single_head_attention(context2, ent2, entity_num_list2, weight, bias)
    attn2 = jax.block_until_ready(attn2)
    ref2 = _reference(context2, ent2, entity_num_list2, weight, bias)
    assert attn2.shape == (B2, Q, S)
    assert jnp.allclose(attn2, ref2, atol=1e-5, rtol=1e-5)

    print("KERNEL_OK")
</pallas_src>

<mosaic_0001>
module attributes {stable_mosaic.version = 11 : i64} {
  func.func @_attn_kernel(%arg0: i32, %arg1: memref<2x8x32xf32, #tpu.memory_space<vmem>>, %arg2: memref<2x16x32xf32, #tpu.memory_space<vmem>>, %arg3: memref<2x1x1xi32, #tpu.memory_space<vmem>>, %arg4: memref<32x32xf32, #tpu.memory_space<vmem>>, %arg5: memref<1x32xf32, #tpu.memory_space<vmem>>, %arg6: memref<2x8x16xf32, #tpu.memory_space<vmem>>) attributes {dimension_semantics = [#tpu.dimension_semantics<parallel>], iteration_bounds = array<i64: 1>, scalar_prefetch = 0 : i64, scratch_operands = 0 : i64, tpu.core_type = #tpu.core_type<tc>, window_params = [{transform_indices = @transform_0, window_bounds = array<i64: 2, 8, 32>}, {transform_indices = @transform_1, window_bounds = array<i64: 2, 16, 32>}, {transform_indices = @transform_2, window_bounds = array<i64: 2, 1, 1>}, {pipeline_mode = #tpu.pipeline_mode<synchronous>, transform_indices = @transform_3, window_bounds = array<i64: 32, 32>}, {pipeline_mode = #tpu.pipeline_mode<synchronous>, transform_indices = @transform_4, window_bounds = array<i64: 1, 32>}, {transform_indices = @transform_5, window_bounds = array<i64: 2, 8, 16>}]} {
    %c0 = arith.constant 0 : index
    %c0_0 = arith.constant 0 : index
    %c0_1 = arith.constant 0 : index
    %0 = vector.load %arg1[%c0, %c0_0, %c0_1] : memref<2x8x32xf32, #tpu.memory_space<vmem>>, vector<2x8x32xf32>
    %1 = vector.shape_cast %0 : vector<2x8x32xf32> to vector<16x32xf32>
    %c0_2 = arith.constant 0 : index
    %c0_3 = arith.constant 0 : index
    %2 = vector.load %arg4[%c0_2, %c0_3] : memref<32x32xf32, #tpu.memory_space<vmem>>, vector<32x32xf32>
    %cst = arith.constant dense<0.000000e+00> : vector<16x32xf32>
    %3 = tpu.matmul %1, %2, %cst {dimension_numbers = #tpu.dot_dimension_numbers<[1], [0], [0], [1], [0, 0, 1, 1], [], []>} : vector<16x32xf32>, vector<32x32xf32>, vector<16x32xf32> -> vector<16x32xf32>
    %c0_4 = arith.constant 0 : index
    %c0_5 = arith.constant 0 : index
    %4 = vector.load %arg5[%c0_4, %c0_5] : memref<1x32xf32, #tpu.memory_space<vmem>>, vector<1x32xf32>
    %5 = vector.broadcast %4 : vector<1x32xf32> to vector<16x32xf32>
    %6 = arith.addf %3, %5 : vector<16x32xf32>
    %7 = vector.shape_cast %6 : vector<16x32xf32> to vector<2x8x32xf32>
    %c0_6 = arith.constant 0 : index
    %c0_7 = arith.constant 0 : index
    %c0_8 = arith.constant 0 : index
    %8 = vector.load %arg2[%c0_6, %c0_7, %c0_8] : memref<2x16x32xf32, #tpu.memory_space<vmem>>, vector<2x16x32xf32>
    "tpu.trace_start"() <{level = 10 : i32, message = "bqd,bsd->bqs"}> : () -> ()
    %cst_9 = arith.constant dense<0.000000e+00> : vector<2x8x16xf32>
    %9 = tpu.matmul %7, %8, %cst_9 {dimension_numbers = #tpu.dot_dimension_numbers<[2], [2], [1], [1], [0, 0, 0, 1, 1, 1], [0], [0]>} : vector<2x8x32xf32>, vector<2x16x32xf32>, vector<2x8x16xf32> -> vector<2x8x16xf32>
    "tpu.trace_stop"() : () -> ()
    %c0_10 = arith.constant 0 : index
    %c0_11 = arith.constant 0 : index
    %c0_12 = arith.constant 0 : index
    %10 = vector.load %arg3[%c0_10, %c0_11, %c0_12] : memref<2x1x1xi32, #tpu.memory_space<vmem>>, vector<2x1x1xi32>
    %11 = tpu.iota {dimensions = array<i32: 2>} : vector<2x8x16xi32>
    %12 = vector.broadcast %10 : vector<2x1x1xi32> to vector<2x8x16xi32>
    %13 = arith.cmpi sge, %11, %12 : vector<2x8x16xi32>
    %cst_13 = arith.constant 0xFF800000 : f32
    %14 = vector.broadcast %cst_13 : f32 to vector<2x8x16xf32>
    %15 = arith.select %13, %14, %9 : vector<2x8x16xi1>, vector<2x8x16xf32>
    %cst_14 = arith.constant dense<0xFF800000> : vector<2x8xf32>
    %16 = vector.multi_reduction <maximumf>, %15, %cst_14 [2] : vector<2x8x16xf32> to vector<2x8xf32>
    %17 = vector.shape_cast %16 : vector<2x8xf32> to vector<2x8x1xf32>
    %18 = vector.broadcast %17 : vector<2x8x1xf32> to vector<2x8x16xf32>
    %19 = arith.subf %15, %18 : vector<2x8x16xf32>
    %20 = math.exp %19 : vector<2x8x16xf32>
    %cst_15 = arith.constant dense<0.000000e+00> : vector<2x8xf32>
    %21 = vector.multi_reduction <add>, %20, %cst_15 [2] : vector<2x8x16xf32> to vector<2x8xf32>
    %22 = vector.shape_cast %21 : vector<2x8xf32> to vector<2x8x1xf32>
    %23 = tpu.reciprocal %22 : vector<2x8x1xf32> -> vector<2x8x1xf32>
    %24 = vector.broadcast %23 : vector<2x8x1xf32> to vector<2x8x16xf32>
    %25 = arith.mulf %20, %24 : vector<2x8x16xf32>
    %c0_16 = arith.constant 0 : index
    %c0_17 = arith.constant 0 : index
    %c0_18 = arith.constant 0 : index
    %26 = vector.load %arg6[%c0_16, %c0_17, %c0_18] : memref<2x8x16xf32, #tpu.memory_space<vmem>>, vector<2x8x16xf32>
    tpu.vector_store %arg6[%c0_16, %c0_17, %c0_18], %25 {strides = array<i32>} : memref<2x8x16xf32, #tpu.memory_space<vmem>>, vector<2x8x16xf32>,
    return
  }
  func.func @transform_0(%arg0: i32) -> (i32, i32, i32) {
    %c0_i32 = arith.constant 0 : i32
    %c0_i32_0 = arith.constant 0 : i32
    %c0_i32_1 = arith.constant 0 : i32
    return %arg0, %c0_i32, %c0_i32_0 : i32, i32, i32
  }
  func.func @transform_1(%arg0: i32) -> (i32, i32, i32) {
    %c0_i32 = arith.constant 0 : i32
    %c0_i32_0 = arith.constant 0 : i32
    %c0_i32_1 = arith.constant 0 : i32
    return %arg0, %c0_i32, %c0_i32_0 : i32, i32, i32
  }
  func.func @transform_2(%arg0: i32) -> (i32, i32, i32) {
    %c0_i32 = arith.constant 0 : i32
    %c0_i32_0 = arith.constant 0 : i32
    %c0_i32_1 = arith.constant 0 : i32
    return %arg0, %c0_i32, %c0_i32_0 : i32, i32, i32
  }
  func.func @transform_3(%arg0: i32) -> (i32, i32) {
    %c0_i32 = arith.constant 0 : i32
    %c0_i32_0 = arith.constant 0 : i32
    %c0_i32_1 = arith.constant 0 : i32
    return %c0_i32, %c0_i32_0 : i32, i32
  }
  func.func @transform_4(%arg0: i32) -> (i32, i32) {
    %c0_i32 = arith.constant 0 : i32
    %c0_i32_0 = arith.constant 0 : i32
    %c0_i32_1 = arith.constant 0 : i32
    return %c0_i32, %c0_i32_0 : i32, i32
  }
  func.func @transform_5(%arg0: i32) -> (i32, i32, i32) {
    %c0_i32 = arith.constant 0 : i32
    %c0_i32_0 = arith.constant 0 : i32
    %c0_i32_1 = arith.constant 0 : i32
    return %arg0, %c0_i32, %c0_i32_0 : i32, i32, i32
  }
}

</mosaic_0001>

<bundles_post_ra>
// kernel: single_head_attention.1
= control target key start
LH: loop header
LB: loop body
LE: loop exit
PB: predicated region body
PF: predicated region fallthrough
CT: control target
= control target key end

     0   :  { %vm34_vm0 = vcmask 261120   ;;  %v445_v6 = vmov 0.0|0.0   ;;  %s553_s0 = inlined_call_operand.vmem [shape: f32[2,8,32], index: 0, kind: input, shape index: {}]   ;;  %s554_s1 = inlined_call_operand.vmem [shape: f32[2,16,32], index: 1, kind: input, shape index: {}]   ;;  %s555_s2 = inlined_call_operand.vmem [shape: s32[2,1,1], index: 2, kind: input, shape index: {}]   ;;  %s556_s3 = inlined_call_operand.vmem [shape: f32[32,32], index: 3, kind: input, shape index: {}]   ;;  %s557_s4 = inlined_call_operand.vmem [shape: f32[1,32], index: 4, kind: input, shape index: {}]   ;;  %s558_s5 = inlined_call_operand.hbm [shape: f32[2,8,16], index: 5, kind: output, shape index: {}]  }
   0x1   :  { %v23_v0 = vld [vmem:[%s556_s3] sm:$0xff]  ;;  %v24_v1 = vld [vmem:[%s556_s3 + $0x8] sm:$0xff]  ;;  %v25_v2 = vld [vmem:[%s556_s3 + $0x10] sm:$0xff]  ;;  %397 = vmatprep.subr.bf16.mxu1 %v445_v6 }
   0x2   :  { %v389_v3 = vpack.c.bf16 %v24_v1, %v23_v0  ;;  %v26_v4 = vld [vmem:[%s556_s3 + $0x18] sm:$0xff]  ;;  %v21_v5 = vld [vmem:[%s553_s0] sm:$0xff]  ;;  %vm500_vm1 = vmpackc.low %vm34_vm0, %vm34_vm0 }
   0x3   :  { %v393_v7 = vpack.c.bf16 %v26_v4, %v25_v2  ;;  %372 = vmatprep.mubr.msk.f32.mxu0 %vm34_vm0, %v21_v5  ;;  %v116_v9 = vld [vmem:[%s554_s1] sm:$0xff]  ;;  %v117_v10 = vld [vmem:[%s554_s1 + $0x8] sm:$0xff] }
   0x4   :  { %390 = vmatprep.subr.bf16.mxu0 %v389_v3 }
   0x5   :  { %10 = vsyncpa [#allocation3], 0  ;;  %392 = vmatpush3.bf16.msra.mxu0 %v389_v3  ;;  %v398_v11 = vpack.c.bf16 %v117_v10, %v116_v9  ;;  %v22_v12 = vld [vmem:[%s553_s0 + $0x8] sm:$0xff]  ;;  %v118_v13 = vld [vmem:[%s554_s1 + $0x10] sm:$0xff]  ;;  %vm446_vm2 = vmmov 0   ;;  %v447_v16 = vmov 0.0   ;;  %v280_v25 = vlaneseq }
   0x6   :  { %394 = vmatprep.subr.bf16.mxu0 %v393_v7  ;;  %v119_v14 = vld [vmem:[%s554_s1 + $0x18] sm:$0xff]  ;;  %379 = vmatprep.mubr.msk.f32.mxu1 %vm446_vm2, %v447_v16  ;;  %v350_v17 = vld [vmem:[%s555_s2] ss:$0 sm:$0xff]  ;;  %v448_v18 = vmov 0   ;;  %v351_v19 = vld [vmem:[%s555_s2 + $0x1] ss:$0 sm:$0xff] }
   0x7   :  { %400 = vmatpush3.bf16.xpose.msk.msra.mxu1 %vm500_vm1, %v398_v11  ;;  %v402_v15 = vpack.c.bf16 %v119_v14, %v118_v13  ;;  %412 = vset.pattern.permute.xlu0 %v448_v18  ;;  %v341_v20 = vld [vmem:[%s557_s4] ss:$0 sm:$0xff]  ;;  %v281_v27 = vand.u32 127, %v280_v25  ;;  %vm300_vm4 = vcmask 130048   ;;  %s449_s2 = smov [#allocation2]  }
   0x8   :  { %291 = vperm.xlu0 %412, %v350_v17   ;;  %s330_s4 = sshll.u32 %s449_s2, 4  ;;  %s331_s4 = int_to_ptr.vmem [resolvable:$true] %s330_s4 }
   0x9   :  { %396 = vmatpush3.bf16.msra.mxu0 %v393_v7  ;;  %s421_s16 = scalar_lea.vmem %s331_s4, 256  ;;  %p426_p1 = scmp.lt.s32.totalorder %s331_s4, %s331_s4 }
   0xa   :  { %401 = vmatprep.subr.bf16.mxu0 %v445_v6  ;;  %p422_p0 = scmp.ne.s32.totalorder %s331_s4, %s421_s16  ;;  %p427_p2 = scmp.lt.s32.totalorder %s421_s16, %s421_s16 }
   0xc   :  { %373 = vmatmul.mubr.msk.f32.vlgmr.msra.gmra.mrb[0].mxu0 %vm34_vm0, %v22_v12  ;;  %294 = vperm.xlu0 %412, %v351_v19   ;;  %p428_p3 = por %p427_p2, %p426_p1 }
   0xd   :  { %386 = vmatprep.mubr.msk.f32.mxu0 %vm446_vm2, %v447_v16 }
   0xe   :  { %p429_p4 = pnand %p428_p3, %p422_p0 }
  0x12   :  { %404 = vmatpush3.bf16.xpose.msk.msra.mxu0 %vm500_vm1, %v402_v15 }
  0x87   :  { %v292_v26 = vpop.permute.xlu0 %291 }
  0x88   :  { %vm296_vm3 = vcmp.ge.s32.totalorder %v281_v27, %v292_v26 }
  0x8b   :  { %v295_v28 = vpop.permute.xlu0 %294 }
  0x8c   :  { %vm297_vm5 = vcmp.ge.s32.totalorder %v281_v27, %v295_v28 }
  0xdf   :  { %v374_v21 = vpop.f32.mrb[0].mxu0 }
  0xe0   :  { %v113_v22 = vadd.f32 %v374_v21, %v341_v20  ;;  %v107_v23 = vpop.f32.mrb[1].mxu0 }
  0xe1   :  { %v108_v24 = vadd.f32 %v341_v20, %v107_v23 }
  0xe2   :  { %387 = vmatmul.mubr.msk.f32.vlgmr.msra.gmra.mrb[2].mxu0 %vm34_vm0, %v113_v22 }
  0xe3   :  { %380 = vmatmul.mubr.msk.f32.vlgmr.msra.gmra.mrb[0].mxu1 %vm34_vm0, %v108_v24 }
 0x1b5   :  { %v274_v29 = vpop.f32.mrb[2].mxu0 }
 0x1b6   :  { %v195_v30 = vpop.f32.mrb[0].mxu1  ;;  %v388_v31 = vpop.f32.mrb[3].mxu0  ;;  %v299_v35 = vsel %vm297_vm5, -inf, %v274_v29 }
 0x1b7   :  { %v298_v32 = vsel %vm296_vm3, -inf, %v195_v30  ;;  %v381_v33 = vpop.f32.mrb[1].mxu1  ;;  %v304_v36 = vsel %vm300_vm4, %v299_v35, -inf }
 0x1b8   :  { %v301_v34 = vsel %vm300_vm4, %v298_v32, -inf }
 0x1b9   :  { %302 = vmax.xlane.f32.xlu1 %v301_v34 }
 0x1bd   :  { %305 = vmax.xlane.f32.xlu1 %v304_v36 }
 0x246   :  { %v303_v37 = vpop.xlane.xlu1 %302 }
 0x247   :  { %v307_v38 = vsub.f32 %v298_v32, %v303_v37 }
 0x249   :  { %v309_v39 = vmul.f32 1.442695, %v307_v38 }
 0x24a   :  { %v306_v40 = vpop.xlane.xlu1 %305 }
 0x24b   :  { %413 = vpow2.f32 %v309_v39  ;;  %v308_v41 = vsub.f32 %v299_v35, %v306_v40 }
 0x24d   :  { %v311_v42 = vmul.f32 1.442695, %v308_v41 }
 0x24f   :  { %415 = vpow2.f32 %v311_v42 }
 0x255   :  { %v414_v43 = vpop.eup %413 }
 0x256   :  { %v313_v44 = vsel %vm300_vm4, %v414_v43, 0.0 }
 0x257   :  { %314 = vadd.xlane.f32.xlu0 %v313_v44 }
 0x259   :  { %v416_v45 = vpop.eup %415 }
 0x25a   :  { %v316_v46 = vsel %vm300_vm4, %v416_v45, 0.0 }
 0x25b   :  { %317 = vadd.xlane.f32.xlu1 %v316_v46 }
 0x2e4   :  { %v315_v47 = vpop.xlane.xlu0 %314 }
 0x2e5   :  { %417 = vrcp.f32 %v315_v47 }
 0x2e8   :  { %v318_v48 = vpop.xlane.xlu1 %317 }
 0x2e9   :  { %419 = vrcp.f32 %v318_v48 }
 0x2ef   :  { %v418_v49 = vpop.eup %417 }
 0x2f0   :  { %v321_v50 = vmul.f32 %v418_v49, %v414_v43 }
 0x2f2   :  { %323 = vst.msk [vmem:[#allocation2] sm:$0xff] %vm300_vm4, %v321_v50 }
 0x2f3   :  { %v420_v51 = vpop.eup %419 }
 0x2f4   :  { %v322_v52 = vmul.f32 %v420_v51, %v416_v45 }
 0x2f6   :  { %324 = vst.msk [vmem:[#allocation2 + $0x8] sm:$0xff] %vm300_vm4, %v322_v52 }
 0x2f7   :  { %432 = shalt.err (!%p429_p4)
}
 0x2f8   :  { %s433_s19 = scalar_lea.hbm %s558_s5, 256 }
 0x2f9   :  { %p434_p5 = scmp.ne.s32.totalorder %s558_s5, %s433_s19  ;;  %p437_p6 = scmp.lt.u32.totalorder %s433_s19, %s558_s5 }
 0x2fb   :  { %p439_p7 = pnand %p437_p6, %p434_p5 }
 0x2fd   :  { %442 = shalt.err (!%p439_p7)
}
 0x2fe   :  { %s450_s24 = smov 128   ;;  %s451_s25 = smov 8  }
 0x2ff   :  { %336 = dma.vmem_to_hbm [thread:$0]  %s331_s4, 256, %s558_s5, [#allocation3], %s450_s24, %s450_s24, %s451_s25  }
 0x300   :  { %443 = dma.done.wait [#allocation3], 256  }
 0x301   :  { %444 = vsyncadd [#allocation3], 4294967040 }
 0x302   :  { %340 = vsyncpa [#allocation3], 1 }

</bundles_post_ra>
